<compile_context>
chip_gen: v6e
topology: v6e:2x2x1
jax: 0.10.0
libtpu: 0.0.40
codegen_flags: <defaults>
</compile_context>

<pallas_src>
import functools

import jax
import jax.numpy as jnp
from jax.experimental import pallas as pl
from jax.experimental.pallas import tpu as pltpu

LANE = 128
_VMEM_LIMIT = 48 * 1024 * 1024   # <= v7x 64 MiB physical VMEM, fine on v5e/v6e too


def _round_up(x, m):
    return (x + m - 1) // m * m


# --------------------------- Pallas kernels ---------------------------------

def _mm_kernel(x_ref, w_ref, s_ref, b_ref, o_ref, acc_ref, *, relu):
    """K-tiled matmul: acc += x @ w; on last K step: out = relu?(acc*scale + bias)."""
    @pl.when(pl.program_id(2) == 0)
    def _():
        acc_ref[...] = jnp.zeros_like(acc_ref)

    acc_ref[...] += jnp.dot(x_ref[...], w_ref[...],
                            preferred_element_type=jnp.float32)

    @pl.when(pl.program_id(2) == pl.num_programs(2) - 1)
    def _():
        acc = acc_ref[...] * s_ref[...] + b_ref[...]
        if relu:
            acc = jnp.maximum(acc, 0.0)
        o_ref[...] = acc.astype(o_ref.dtype)


def _conv_s1_kernel(x_ref, w_ref, s_ref, b_ref, *rest, Wp, kw, relu):
    """Stride-1 KxK conv on a flattened padded image (no im2col).

    x_ref:   (1, Hp*Wp, Cin)   flattened padded input (bf16)
    w_ref:   (kh*kw, Cin, tco) per-window weight matrices (bf16)
    s/b_ref: (1, tco)          folded-BN scale / bias (f32)
    rest:    [residual (1, M, tco) bf16,] output (1, M, tco) with M = Ho*Wp
    """
    o_ref = rest[-1]
    r_ref = rest[0] if len(rest) == 2 else None
    x = x_ref[0]                                 # (Hp*Wp, Cin)
    m = o_ref.shape[1]                           # Ho * Wp (incl. discarded columns)
    acc = jnp.zeros((m, o_ref.shape[2]), jnp.float32)
    for q in range(w_ref.shape[0]):
        di, dj = q // kw, q % kw
        off = di * Wp + dj                       # static flat window offset
        acc = acc + jnp.dot(x[off:off + m, :], w_ref[q],
                            preferred_element_type=jnp.float32)
    acc = acc * s_ref[...] + b_ref[...]
    if r_ref is not None:
        acc = acc + r_ref[0].astype(jnp.float32)
    if relu:
        acc = jnp.maximum(acc, 0.0)
    o_ref[0] = acc.astype(o_ref.dtype)


def _maxpool_kernel(x_ref, o_ref, *, Wp):
    """Dense 3x3 stride-1 max over a flattened padded image; subsample done outside."""
    x = x_ref[0]                                 # (Hp*Wp, C)
    m = o_ref.shape[1]
    r = x[0:m, :]
    for q in range(1, 9):
        di, dj = q // 3, q % 3
        off = di * Wp + dj
        r = jnp.maximum(r, x[off:off + m, :])
    o_ref[0] = r


def _head_kernel(*refs, inv_hw, nlayers):
    """Fused: global average pool -> (Linear + ReLU)* -> Linear (classifier)."""
    x_ref, o_ref = refs[0], refs[-1]
    wb = refs[1:-1]
    h = jnp.sum(x_ref[...].astype(jnp.float32), axis=1) * inv_hw     # (N, C)
    for li in range(nlayers):
        h = jnp.dot(h, wb[2 * li][...],
                    preferred_element_type=jnp.float32) + wb[2 * li + 1][...]
        if li < nlayers - 1:
            h = jnp.maximum(h, 0.0)
        # TODO(synk): dropout with keep_prob < 1 (training-mode RNG) not implemented;
        # keep_prob == 1.0 -> identity.
    o_ref[...] = h


# --------------------------- kernel wrappers ---------------------------------

def matmul_tiled(x2d, w2d, scale, bias, relu, out_dtype=jnp.bfloat16):
    """relu?( (x2d @ w2d) * scale + bias ), tiled over (M, N, K) with f32 accumulator.

    x2d: (M, K) any float dtype; w2d: (Kw, Np) bf16 with Kw, Np multiples of 128
    (Kw >= K; x is zero-padded to match).  scale/bias: (1, Np) f32.
    """
    M, K = x2d.shape
    Kw, Np = w2d.shape
    assert Kw % LANE == 0 and Np % LANE == 0 and Kw >= K

    x2d = x2d.astype(jnp.bfloat16)
    if K < Kw:
        x2d = jnp.pad(x2d, ((0, 0), (0, Kw - K)))

    tn = 256 if Np % 256 == 0 else 128
    tk = 512 if Kw % 512 == 0 else (256 if Kw % 256 == 0 else 128)
    Mp = _round_up(max(M, 8), 8)
    tm = Mp if Mp <= 256 else 256
    Mp = _round_up(Mp, tm)
    if Mp > M:
        x2d = jnp.pad(x2d, ((0, Mp - M), (0, 0)))

    grid = (Mp // tm, Np // tn, Kw // tk)
    out = pl.pallas_call(
        functools.partial(_mm_kernel, relu=relu),
        out_shape=jax.ShapeDtypeStruct((Mp, Np), out_dtype),
        grid_spec=pltpu.PrefetchScalarGridSpec(
            num_scalar_prefetch=0,
            grid=grid,
            in_specs=[
                pl.BlockSpec((tm, tk), lambda i, j, k: (i, k)),
                pl.BlockSpec((tk, tn), lambda i, j, k: (k, j)),
                pl.BlockSpec((1, tn), lambda i, j, k: (0, j)),
                pl.BlockSpec((1, tn), lambda i, j, k: (0, j)),
            ],
            out_specs=pl.BlockSpec((tm, tn), lambda i, j, k: (i, j)),
            scratch_shapes=[pltpu.VMEM((tm, tn), jnp.float32)],
        ),
        compiler_params=pltpu.CompilerParams(
            dimension_semantics=("parallel", "parallel", "arbitrary"),
            vmem_limit_bytes=_VMEM_LIMIT),
        cost_estimate=pl.CostEstimate(
            flops=2 * Mp * Np * Kw, transcendentals=0,
            bytes_accessed=2 * (Mp * Kw + Kw * Np + Mp * Np)),
    )(x2d, w2d, scale, bias)
    return out[:M]


def conv_im2col(x, w2d, scale, bias, *, kh, kw, stride, padding, relu):
    """Generic conv via host im2col + tiled matmul (used only for the strided convs).

    x: (N, H, W, Cin) NHWC; w2d: (round_up(kh*kw*Cin,128), Coutp) bf16.
    TODO(synk): conv1 (7x7/s2) and the three stride-2 3x3 convs still stage an
    im2col patch matrix in HBM; only stride-1 3x3 convs are fully im2col-free.
    """
    N, H, W, Cin = x.shape
    Ho = (H + 2 * padding - kh) // stride + 1
    Wo = (W + 2 * padding - kw) // stride + 1
    xp = jnp.pad(x.astype(jnp.bfloat16),
                 ((0, 0), (padding, padding), (padding, padding), (0, 0)))
    cols = []
    for di in range(kh):
        for dj in range(kw):
            cols.append(xp[:, di:di + stride * (Ho - 1) + 1:stride,
                              dj:dj + stride * (Wo - 1) + 1:stride, :])
    patches = jnp.concatenate(cols, axis=-1).reshape(N * Ho * Wo, kh * kw * Cin)
    out = matmul_tiled(patches, w2d, scale, bias, relu=relu)
    return out.reshape(N, Ho, Wo, w2d.shape[1])


def conv3x3_s1(x, w9, scale, bias, relu=True, residual=None):
    """Stride-1 3x3 'same' conv + folded BN + optional residual + ReLU (no im2col).

    x: (N, H, W, Cinp) bf16; w9: (9, Cinp, Coutp) bf16; scale/bias: (1, Coutp) f32;
    residual: (N, H, W, Coutp) bf16 or None.
    """
    N, H, W, Cin = x.shape
    Coutp = w9.shape[2]
    kh = kw = 3
    # pad: 1 row top / 2 rows bottom (extra guard row for the flat-shift reads),
    #      1 col left / 1 col right.
    Hp, Wp = H + kh, W + kw - 1
    xp = jnp.pad(x.astype(jnp.bfloat16), ((0, 0), (1, kh - 1), (1, 1), (0, 0)))
    xflat = xp.reshape(N, Hp * Wp, Cin)
    M = H * Wp                         # Ho == H; includes (Wp-W) discarded cols / row

    tco = 256 if Coutp % 256 == 0 else 128
    grid = (N, Coutp // tco)

    in_specs = [
        pl.BlockSpec((1, Hp * Wp, Cin), lambda n, j: (n, 0, 0)),
        pl.BlockSpec((kh * kw, Cin, tco), lambda n, j: (0, 0, j)),
        pl.BlockSpec((1, tco), lambda n, j: (0, j)),
        pl.BlockSpec((1, tco), lambda n, j: (0, j)),
    ]
    inputs = [xflat, w9, scale, bias]
    if residual is not None:
        rflat = jnp.pad(residual.astype(jnp.bfloat16),
                        ((0, 0), (0, 0), (0, Wp - W), (0, 0))).reshape(N, M, Coutp)
        in_specs.append(pl.BlockSpec((1, M, tco), lambda n, j: (n, 0, j)))
        inputs.append(rflat)

    out = pl.pallas_call(
        functools.partial(_conv_s1_kernel, Wp=Wp, kw=kw, relu=relu),
        out_shape=jax.ShapeDtypeStruct((N, M, Coutp), jnp.bfloat16),
        grid_spec=pltpu.PrefetchScalarGridSpec(
            num_scalar_prefetch=0,
            grid=grid,
            in_specs=in_specs,
            out_specs=pl.BlockSpec((1, M, tco), lambda n, j: (n, 0, j)),
        ),
        compiler_params=pltpu.CompilerParams(
            dimension_semantics=("parallel", "parallel"),
            vmem_limit_bytes=_VMEM_LIMIT),
        cost_estimate=pl.CostEstimate(
            flops=2 * N * M * kh * kw * Cin * Coutp, transcendentals=0,
            bytes_accessed=2 * N * (Hp * Wp * Cin + 2 * M * Coutp)
            + 2 * kh * kw * Cin * Coutp),
    )(*inputs)
    # drop the Wp-W garbage columns per output row
    return out.reshape(N, H, Wp, Coutp)[:, :, :W, :]


def conv1x1_s2(x, w2d, scale, bias):
    """1x1 / stride-2 downsample conv + folded BN (no ReLU)."""
    xs = x[:, ::2, ::2, :]
    N, Ho, Wo, Cin = xs.shape
    out = matmul_tiled(xs.reshape(N * Ho * Wo, Cin), w2d, scale, bias, relu=False)
    return out.reshape(N, Ho, Wo, w2d.shape[1])


def maxpool_3x3_s2(x):
    """nn.MaxPool2d(kernel_size=3, stride=2, padding=1) on NHWC without 9x staging."""
    N, H, W, C = x.shape
    Ho = (H - 1) // 2 + 1
    Wo = (W - 1) // 2 + 1
    Hp, Wp = H + 3, W + 2
    xp = jnp.pad(x, ((0, 0), (1, 2), (1, 1), (0, 0)), constant_values=-1e30)
    xflat = xp.reshape(N, Hp * Wp, C)
    M = H * Wp
    out = pl.pallas_call(
        functools.partial(_maxpool_kernel, Wp=Wp),
        out_shape=jax.ShapeDtypeStruct((N, M, C), x.dtype),
        grid_spec=pltpu.PrefetchScalarGridSpec(
            num_scalar_prefetch=0,
            grid=(N,),
            in_specs=[pl.BlockSpec((1, Hp * Wp, C), lambda n: (n, 0, 0))],
            out_specs=pl.BlockSpec((1, M, C), lambda n: (n, 0, 0)),
        ),
        compiler_params=pltpu.CompilerParams(
            dimension_semantics=("parallel",), vmem_limit_bytes=_VMEM_LIMIT),
    )(xflat)
    dense = out.reshape(N, H, Wp, C)
    return dense[:, ::2, ::2, :][:, :Ho, :Wo, :]


def head_forward(x, head_params, num_classes):
    """Fused adaptive_avg_pool2d((1,1)) + flatten + fcs (Linear+ReLU) + classifier."""
    N, H, W, C = x.shape
    xf = x.reshape(N, H * W, C)
    flat = []
    for (w, b) in head_params:
        flat += [w, b]
    return pl.pallas_call(
        functools.partial(_head_kernel, inv_hw=1.0 / float(H * W),
                          nlayers=len(head_params)),
        out_shape=jax.ShapeDtypeStruct((N, num_classes), jnp.float32),
        compiler_params=pltpu.CompilerParams(vmem_limit_bytes=_VMEM_LIMIT),
    )(xf, *flat)


# --------------------------- parameter construction --------------------------

def make_resnet18_params(key, in_channels, fc_dims, num_classes):
    keys = iter(jax.random.split(key, 256))

    def nrm(shape, std):
        return std * jax.random.normal(next(keys), shape, jnp.float32)

    def bn_fold(c, cp):
        # inference-mode BatchNorm folded into per-channel scale/bias, zero-padded
        gamma = 1.0 + 0.1 * nrm((c,), 1.0)
        beta = 0.1 * nrm((c,), 1.0)
        scale = gamma / jnp.sqrt(1.0 + 1e-5)        # running_var=1, running_mean=0
        bias = beta
        scale = jnp.pad(scale, (0, cp - c)).reshape(1, cp).astype(jnp.float32)
        bias = jnp.pad(bias, (0, cp - c)).reshape(1, cp).astype(jnp.float32)
        return scale, bias

    def conv_w(kh, kw, cin, cout, cinp, coutp):
        w = nrm((kh, kw, cin, cout), (1.0 / (kh * kw * cin)) ** 0.5)
        return jnp.pad(w, ((0, 0), (0, 0), (0, cinp - cin), (0, coutp - cout)))

    params = {"num_classes": num_classes}

    # conv1: 7x7 / s2 / p3, in_channels -> 64 (lane-padded to 128), im2col layout.
    coutp = _round_up(64, LANE)
    w1 = conv_w(7, 7, in_channels, 64, in_channels, coutp)
    k_true = 7 * 7 * in_channels
    wm = w1.reshape(k_true, coutp)
    wm = jnp.pad(wm, ((0, _round_up(k_true, LANE) - k_true), (0, 0)))
    s, b = bn_fold(64, coutp)
    params["conv1"] = {"w": wm.astype(jnp.bfloat16), "scale": s, "bias": b}

    # BasicBlock stages: (out_ch, stride, num_blocks)
    stages = []
    in_ch = 64
    for out_ch, stride, nblocks in [(64, 1, 2), (128, 2, 2),
                                    (256, 2, 2), (512, 2, 2)]:
        blocks = []
        for bi in range(nblocks):
            st = stride if bi == 0 else 1
            cinp = _round_up(in_ch, LANE)
            coutp = _round_up(out_ch, LANE)
            blk = {"stride": st}
            w1_ = conv_w(3, 3, in_ch, out_ch, cinp, coutp)
            if st == 1:
                blk["w1"] = w1_.reshape(9, cinp, coutp).astype(jnp.bfloat16)
            else:
                blk["w1"] = w1_.reshape(9 * cinp, coutp).astype(jnp.bfloat16)
            blk["s1"], blk["b1"] = bn_fold(out_ch, coutp)
            w2_ = conv_w(3, 3, out_ch, out_ch, coutp, coutp)
            blk["w2"] = w2_.reshape(9, coutp, coutp).astype(jnp.bfloat16)
            blk["s2"], blk["b2"] = bn_fold(out_ch, coutp)
            if st != 1 or in_ch != out_ch:
                wd = conv_w(1, 1, in_ch, out_ch, cinp, coutp)
                blk["wd"] = wd.reshape(cinp, coutp).astype(jnp.bfloat16)
                blk["sd"], blk["bd"] = bn_fold(out_ch, coutp)
            blocks.append(blk)
            in_ch = out_ch
        stages.append(blocks)
    params["stages"] = stages

    # FC head: Linear(512 -> fc dims) + ReLU (+ Dropout identity), then classifier.
    dims = [512] + list(fc_dims) + [num_classes]
    head = []
    for i in range(len(dims) - 1):
        w = nrm((dims[i], dims[i + 1]), (1.0 / dims[i]) ** 0.5)
        if i < len(dims) - 2:
            bvec = 0.1 * nrm((dims[i + 1],), 1.0)
        else:
            bvec = jnp.zeros((dims[i + 1],), jnp.float32)
        head.append((w, bvec.reshape(1, dims[i + 1]).astype(jnp.float32)))
    params["head"] = head
    return params


# --------------------------- forward pass ------------------------------------

def resnet_forward(params, image_nchw):
    # NCHW (PyTorch) -> NHWC bf16
    x = jnp.transpose(image_nchw, (0, 2, 3, 1)).astype(jnp.bfloat16)

    # conv1 -> bn1 -> relu
    c1 = params["conv1"]
    x = conv_im2col(x, c1["w"], c1["scale"], c1["bias"],
                    kh=7, kw=7, stride=2, padding=3, relu=True)
    # maxpool 3x3 / s2 / p1
    x = maxpool_3x3_s2(x)

    # layer1..layer4 (BasicBlocks)
    for blocks in params["stages"]:
        for blk in blocks:
            if blk["stride"] == 1:
                out = conv3x3_s1(x, blk["w1"], blk["s1"], blk["b1"], relu=True)
            else:
                out = conv_im2col(x, blk["w1"], blk["s1"], blk["b1"],
                                  kh=3, kw=3, stride=2, padding=1, relu=True)
            if "wd" in blk:
                shortcut = conv1x1_s2(x, blk["wd"], blk["sd"], blk["bd"])
            else:
                shortcut = x
            # conv2 + bn2 + residual add + relu, fused in one Pallas kernel
            x = conv3x3_s1(out, blk["w2"], blk["s2"], blk["b2"],
                           relu=True, residual=shortcut)

    # fused global avg pool + fcs + classifier
    return head_forward(x, params["head"], params["num_classes"])


# --------------------------- demo --------------------------------------------

if __name__ == "__main__":
    key = jax.random.PRNGKey(0)
    pkey, xkey = jax.random.split(key)

    in_channels = 4      # FLAGS.num_channels != 3 -> fresh conv1 / bn1 branch
    num_classes = 10     # FLAGS.num_classes
    fc_dims = [32]       # FLAGS.fc = "32"

    params = make_resnet18_params(pkey, in_channels, fc_dims, num_classes)
    x = jax.random.normal(xkey, (2, in_channels, 16, 16), jnp.float32)  # NCHW

    logits = resnet_forward(params, x)
    logits = jax.block_until_ready(logits)
    assert logits.shape == (2, num_classes)
    assert bool(jnp.all(jnp.isfinite(logits)))
    print("KERNEL_OK")
</pallas_src>

<mosaic_0001>
module attributes {stable_mosaic.version = 11 : i64} {
  func.func @_mm_kernel(%arg0: i32, %arg1: i32, %arg2: i32, %arg3: memref<128x256xbf16, #tpu.memory_space<vmem>>, %arg4: memref<256x128xbf16, #tpu.memory_space<vmem>>, %arg5: memref<1x128xf32, #tpu.memory_space<vmem>>, %arg6: memref<1x128xf32, #tpu.memory_space<vmem>>, %arg7: memref<128x128xbf16, #tpu.memory_space<vmem>>, %arg8: memref<128x128xf32, #tpu.memory_space<vmem>>) attributes {dimension_semantics = [#tpu.dimension_semantics<parallel>, #tpu.dimension_semantics<parallel>, #tpu.dimension_semantics<arbitrary>], iteration_bounds = array<i64: 1, 1, 1>, scalar_prefetch = 0 : i64, scratch_operands = 1 : i64, tpu.core_type = #tpu.core_type<tc>, window_params = [{transform_indices = @transform_0, window_bounds = array<i64: 128, 256>}, {transform_indices = @transform_1, window_bounds = array<i64: 256, 128>}, {transform_indices = @transform_2, window_bounds = array<i64: 1, 128>}, {transform_indices = @transform_3, window_bounds = array<i64: 1, 128>}, {transform_indices = @transform_4, window_bounds = array<i64: 128, 128>}]} {
    %c0_i32 = arith.constant 0 : i32
    %0 = arith.cmpi eq, %arg2, %c0_i32 : i32
    %1 = arith.extui %0 : i1 to i32
    %c0_i32_0 = arith.constant 0 : i32
    %2 = arith.cmpi ne, %1, %c0_i32_0 : i32
    scf.if %2 {
      %cst_10 = arith.constant 0.000000e+00 : f32
      %12 = vector.broadcast %cst_10 : f32 to vector<128x128xf32>
      %c0_11 = arith.constant 0 : index
      %c0_12 = arith.constant 0 : index
      %13 = vector.load %arg8[%c0_11, %c0_12] : memref<128x128xf32, #tpu.memory_space<vmem>>, vector<128x128xf32>
      tpu.vector_store %arg8[%c0_11, %c0_12], %12 {strides = array<i32>} : memref<128x128xf32, #tpu.memory_space<vmem>>, vector<128x128xf32>,
    } else {
    }
    %c0 = arith.constant 0 : index
    %c0_1 = arith.constant 0 : index
    %3 = vector.load %arg8[%c0, %c0_1] : memref<128x128xf32, #tpu.memory_space<vmem>>, vector<128x128xf32>
    %c0_2 = arith.constant 0 : index
    %c0_3 = arith.constant 0 : index
    %4 = vector.load %arg3[%c0_2, %c0_3] : memref<128x256xbf16, #tpu.memory_space<vmem>>, vector<128x256xbf16>
    %c0_4 = arith.constant 0 : index
    %c0_5 = arith.constant 0 : index
    %5 = vector.load %arg4[%c0_4, %c0_5] : memref<256x128xbf16, #tpu.memory_space<vmem>>, vector<256x128xbf16>
    %cst = arith.constant dense<0.000000e+00> : vector<128x128xf32>
    %6 = tpu.matmul %4, %5, %cst {dimension_numbers = #tpu.dot_dimension_numbers<[1], [0], [0], [1], [0, 0, 1, 1], [], []>} : vector<128x256xbf16>, vector<256x128xbf16>, vector<128x128xf32> -> vector<128x128xf32>
    %7 = arith.addf %3, %6 : vector<128x128xf32>
    %c0_6 = arith.constant 0 : index
    %c0_7 = arith.constant 0 : index
    %8 = vector.load %arg8[%c0_6, %c0_7] : memref<128x128xf32, #tpu.memory_space<vmem>>, vector<128x128xf32>
    tpu.vector_store %arg8[%c0_6, %c0_7], %7 {strides = array<i32>} : memref<128x128xf32, #tpu.memory_space<vmem>>, vector<128x128xf32>,
    %c0_i32_8 = arith.constant 0 : i32
    %9 = arith.cmpi eq, %arg2, %c0_i32_8 : i32
    %10 = arith.extui %9 : i1 to i32
    %c0_i32_9 = arith.constant 0 : i32
    %11 = arith.cmpi ne, %10, %c0_i32_9 : i32
    scf.if %11 {
      %c0_10 = arith.constant 0 : index
      %c0_11 = arith.constant 0 : index
      %12 = vector.load %arg8[%c0_10, %c0_11] : memref<128x128xf32, #tpu.memory_space<vmem>>, vector<128x128xf32>
      %c0_12 = arith.constant 0 : index
      %c0_13 = arith.constant 0 : index
      %13 = vector.load %arg5[%c0_12, %c0_13] : memref<1x128xf32, #tpu.memory_space<vmem>>, vector<1x128xf32>
      %14 = vector.broadcast %13 : vector<1x128xf32> to vector<128x128xf32>
      %15 = arith.mulf %12, %14 : vector<128x128xf32>
      %c0_14 = arith.constant 0 : index
      %c0_15 = arith.constant 0 : index
      %16 = vector.load %arg6[%c0_14, %c0_15] : memref<1x128xf32, #tpu.memory_space<vmem>>, vector<1x128xf32>
      %17 = vector.broadcast %16 : vector<1x128xf32> to vector<128x128xf32>
      %18 = arith.addf %15, %17 : vector<128x128xf32>
      %cst_16 = arith.constant 0.000000e+00 : f32
      %19 = vector.broadcast %cst_16 : f32 to vector<128x128xf32>
      %20 = arith.maximumf %18, %19 : vector<128x128xf32>
      %21 = arith.truncf %20 : vector<128x128xf32> to vector<128x128xbf16>
      %c0_17 = arith.constant 0 : index
      %c0_18 = arith.constant 0 : index
      %22 = vector.load %arg7[%c0_17, %c0_18] : memref<128x128xbf16, #tpu.memory_space<vmem>>, vector<128x128xbf16>
      tpu.vector_store %arg7[%c0_17, %c0_18], %21 {strides = array<i32>} : memref<128x128xbf16, #tpu.memory_space<vmem>>, vector<128x128xbf16>,
    } else {
    }
    return
  }
  func.func @transform_0(%arg0: i32, %arg1: i32, %arg2: i32) -> (i32, i32) {
    %c0_i32 = arith.constant 0 : i32
    return %arg0, %arg2 : i32, i32
  }
  func.func @transform_1(%arg0: i32, %arg1: i32, %arg2: i32) -> (i32, i32) {
    %c0_i32 = arith.constant 0 : i32
    return %arg2, %arg1 : i32, i32
  }
  func.func @transform_2(%arg0: i32, %arg1: i32, %arg2: i32) -> (i32, i32) {
    %c0_i32 = arith.constant 0 : i32
    %c0_i32_0 = arith.constant 0 : i32
    return %c0_i32, %arg1 : i32, i32
  }
  func.func @transform_3(%arg0: i32, %arg1: i32, %arg2: i32) -> (i32, i32) {
    %c0_i32 = arith.constant 0 : i32
    %c0_i32_0 = arith.constant 0 : i32
    return %c0_i32, %arg1 : i32, i32
  }
  func.func @transform_4(%arg0: i32, %arg1: i32, %arg2: i32) -> (i32, i32) {
    %c0_i32 = arith.constant 0 : i32
    return %arg0, %arg1 : i32, i32
  }
}

</mosaic_0001>

<bundles_post_ra>
// kernel: tpu_custom_call.1
= control target key start
LH: loop header
LB: loop body
LE: loop exit
PB: predicated region body
PF: predicated region fallthrough
CT: control target
= control target key end

     0   :  { %9 = vsyncpa [#allocation4], 0  ;;  %s1010_s0 = inlined_call_operand.hbm [shape: bf16[128,256], index: 0, kind: input, shape index: {}]   ;;  %s1011_s1 = inlined_call_operand.hbm [shape: bf16[256,128], index: 1, kind: input, shape index: {}]   ;;  %s1012_s2 = inlined_call_operand.vmem [shape: f32[1,128], index: 2, kind: input, shape index: {}]   ;;  %s1013_s3 = inlined_call_operand.vmem [shape: f32[1,128], index: 3, kind: input, shape index: {}]   ;;  %s1014_s4 = inlined_call_operand.hbm [shape: bf16[128,128], index: 4, kind: output, shape index: {}]  }
   0x1   :  { %10 = vsyncpa [#allocation7], 0 }
   0x2   :  { %11 = vsyncpa [#allocation5], 0  ;;  %s921_s15 = smov [#allocation3]  }
   0x3   :  { %s17_s16 = sshll.u32 %s921_s15, 4  ;;  %s18_s16 = int_to_ptr.vmem [resolvable:$true] %s17_s16 }
   0x4   :  { %s863_s17 = scalar_lea.vmem %s18_s16, 2048  ;;  %p868_p1 = scmp.lt.s32.totalorder %s18_s16, %s18_s16 }
   0x5   :  { %p864_p0 = scmp.ne.s32.totalorder %s18_s16, %s863_s17  ;;  %p869_p2 = scmp.lt.s32.totalorder %s863_s17, %s863_s17 }
   0x7   :  { %p870_p3 = por %p869_p2, %p868_p1 }
   0x9   :  { %p871_p4 = pnand %p870_p3, %p864_p0 }
   0xb   :  { %874 = shalt.err (!%p871_p4)
}
   0xc   :  { %s922_s18 = smov 128   ;;  %s923_s19 = smov 8  }
   0xd   :  { %23 = dma.hbm_to_vmem [thread:$0]  %s1010_s0, 2048, %s18_s16, [#allocation4], %s922_s18, %s922_s18, %s923_s19  }
   0xe   :  { %s924_s22 = smov [#allocation6]  }
   0xf   :  { %s29_s23 = sshll.u32 %s924_s22, 4  ;;  %s30_s23 = int_to_ptr.vmem [resolvable:$true] %s29_s23 }
  0x10   :  { %s883_s24 = scalar_lea.vmem %s30_s23, 2048  ;;  %p888_p6 = scmp.lt.s32.totalorder %s30_s23, %s30_s23 }
  0x11   :  { %p884_p5 = scmp.ne.s32.totalorder %s30_s23, %s883_s24  ;;  %p889_p7 = scmp.lt.s32.totalorder %s883_s24, %s883_s24 }
  0x13   :  { %p890_p8 = por %p889_p7, %p888_p6 }
  0x15   :  { %p891_p9 = pnand %p890_p8, %p884_p5 }
  0x17   :  { %894 = shalt.err (!%p891_p9)
}
  0x18   :  { %s925_s25 = smov 64   ;;  %s926_s26 = smov 4  }
  0x19   :  { %35 = dma.hbm_to_vmem [thread:$0]  %s1011_s1, 2048, %s30_s23, [#allocation7], %s925_s25, %s925_s25, %s926_s26  }
  0x1a   :  { %915 = dma.done.wait [#allocation4], 2048  }
  0x1b   :  { %916 = vsyncadd [#allocation4], 4294965248 }
  0x1c   :  { %917 = dma.done.wait [#allocation7], 2048  }
  0x1d   :  { %918 = vsyncadd [#allocation7], 4294965248  ;;  %v815_v0 = vld [vmem:[#allocation6 + $0x78] sm:$0xff]   ;;  %v817_v2 = vld [vmem:[#allocation6 + $0x70] sm:$0xff]  }
  0x1e   :  { %v816_v1 = vld [vmem:[#allocation6 + $0x38] sm:$0xff]   ;;  %728 = vmatprep.subr.bf16.mxu0 %v815_v0  ;;  %792 = vmatprep.subr.bf16.mxu1 %v815_v0  ;;  %v818_v3 = vld [vmem:[#allocation6 + $0x30] sm:$0xff]   ;;  %v819_v4 = vld [vmem:[#allocation6 + $0x68] sm:$0xff]  }
  0x1f   :  { %729 = vmatpush3.bf16.msra.mxu0 %v816_v1  ;;  %800 = vmatpush3.bf16.msra.mxu1 %v816_v1  ;;  %v820_v5 = vld [vmem:[#allocation6 + $0x28] sm:$0xff]   ;;  %v821_v6 = vld [vmem:[#allocation6 + $0x60] sm:$0xff]   ;;  %v823_v8 = vld [vmem:[#allocation6 + $0x58] sm:$0xff]  }
  0x20   :  { %730 = vmatprep.subr.bf16.mxu0 %v817_v2  ;;  %793 = vmatprep.subr.bf16.mxu1 %v817_v2  ;;  %v822_v7 = vld [vmem:[#allocation6 + $0x20] sm:$0xff]   ;;  %v824_v9 = vld [vmem:[#allocation6 + $0x18] sm:$0xff]   ;;  %v825_v10 = vld [vmem:[#allocation6 + $0x50] sm:$0xff]  }
  0x21   :  { %v833_v11 = vld [vmem:[#allocation3 + $0x4] ss:$8 sps:$4 sm:$0xff]   ;;  %v826_v13 = vld [vmem:[#allocation6 + $0x10] sm:$0xff]   ;;  %v831_v18 = vld [vmem:[#allocation3] ss:$8 sps:$4 sm:$0xff]  }
  0x22   :  { %v836_v12 = vld [vmem:[#allocation3 + $0x44] ss:$8 sps:$4 sm:$0xff]   ;;  %339 = vmatprep.mubr.bf16.mxu0 %v833_v11  ;;  %v834_v19 = vld [vmem:[#allocation3 + $0x40] ss:$8 sps:$4 sm:$0xff]   ;;  %v837_v20 = vld [vmem:[#allocation3 + $0x14] ss:$8 sps:$4 sm:$0xff]  }
  0x23   :  { %731 = vmatpush3.bf16.msra.mxu0 %v818_v3  ;;  %801 = vmatpush3.bf16.msra.mxu1 %v818_v3  ;;  %v827_v14 = vld [vmem:[#allocation6 + $0x48] sm:$0xff]   ;;  %v829_v16 = vld [vmem:[#allocation6 + $0x40] sm:$0xff]   ;;  %v839_v21 = vld [vmem:[#allocation3 + $0x54] ss:$8 sps:$4 sm:$0xff]  }
  0x24   :  { %732 = vmatprep.subr.bf16.mxu0 %v819_v4  ;;  %794 = vmatprep.subr.bf16.mxu1 %v819_v4  ;;  %v828_v15 = vld [vmem:[#allocation6 + $0x8] sm:$0xff]   ;;  %v830_v17 = vld [vmem:[#allocation6] sm:$0xff]   ;;  %v841_v22 = vld [vmem:[#allocation3 + $0x10] ss:$8 sps:$4 sm:$0xff]  }
  0x25   :  { %371 = vmatprep.mubr.bf16.mxu1 %v836_v12  ;;  %v842_v23 = vld [vmem:[#allocation3 + $0x50] ss:$8 sps:$4 sm:$0xff]   ;;  %v843_v24 = vld [vmem:[#allocation3 + $0x24] ss:$8 sps:$4 sm:$0xff]   ;;  %v847_v26 = vld [vmem:[#allocation3 + $0x20] ss:$8 sps:$4 sm:$0xff]  }
  0x26   :  { %v845_v25 = vld [vmem:[#allocation3 + $0x64] ss:$8 sps:$4 sm:$0xff]   ;;  %v848_v27 = vld [vmem:[#allocation3 + $0x60] ss:$8 sps:$4 sm:$0xff]   ;;  %v849_v28 = vld [vmem:[#allocation3 + $0x34] ss:$8 sps:$4 sm:$0xff]  }
  0x27   :  { %733 = vmatpush3.bf16.msra.mxu0 %v820_v5  ;;  %802 = vmatpush3.bf16.msra.mxu1 %v820_v5  ;;  %v851_v29 = vld [vmem:[#allocation3 + $0x74] ss:$8 sps:$4 sm:$0xff]   ;;  %v853_v30 = vld [vmem:[#allocation3 + $0x30] ss:$8 sps:$4 sm:$0xff]   ;;  %v965_v35 = vld [vmem:[%s1012_s2] ss:$0 sm:$0xff] }
  0x28   :  { %734 = vmatprep.subr.bf16.mxu0 %v821_v6  ;;  %795 = vmatprep.subr.bf16.mxu1 %v821_v6  ;;  %v854_v31 = vld [vmem:[#allocation3 + $0x70] ss:$8 sps:$4 sm:$0xff]   ;;  %v972_v43 = vld [vmem:[%s1013_s3] ss:$0 sm:$0xff]  ;;  %s927_s2 = smov [#allocation8]  }
  0x29   :  { %s602_s3 = sshll.u32 %s927_s2, 4  ;;  %s603_s3 = int_to_ptr.vmem [resolvable:$true] %s602_s3 }
  0x2a   :  { %s895_s5 = scalar_lea.vmem %s603_s3, 1024  ;;  %p900_p11 = scmp.lt.s32.totalorder %s603_s3, %s603_s3 }
  0x2b   :  { %735 = vmatpush3.bf16.msra.mxu0 %v822_v7  ;;  %803 = vmatpush3.bf16.msra.mxu1 %v822_v7  ;;  %p896_p10 = scmp.ne.s32.totalorder %s603_s3, %s895_s5  ;;  %p901_p12 = scmp.lt.s32.totalorder %s895_s5, %s895_s5 }
  0x2c   :  { %736 = vmatprep.subr.bf16.mxu0 %v823_v8  ;;  %796 = vmatprep.subr.bf16.mxu1 %v823_v8 }
  0x2d   :  { %p902_p13 = por %p901_p12, %p900_p11 }
  0x2f   :  { %737 = vmatpush3.bf16.msra.mxu0 %v824_v9  ;;  %804 = vmatpush3.bf16.msra.mxu1 %v824_v9  ;;  %p903_p0 = pnand %p902_p13, %p896_p10 }
  0x30   :  { %738 = vmatprep.subr.bf16.mxu0 %v825_v10  ;;  %797 = vmatprep.subr.bf16.mxu1 %v825_v10 }
  0x33   :  { %739 = vmatpush3.bf16.msra.mxu0 %v826_v13  ;;  %805 = vmatpush3.bf16.msra.mxu1 %v826_v13 }
  0x34   :  { %740 = vmatprep.subr.bf16.mxu0 %v827_v14  ;;  %798 = vmatprep.subr.bf16.mxu1 %v827_v14 }
  0x37   :  { %741 = vmatpush3.bf16.msra.mxu0 %v828_v15  ;;  %806 = vmatpush3.bf16.msra.mxu1 %v828_v15 }
  0x38   :  { %742 = vmatprep.subr.bf16.mxu0 %v829_v16  ;;  %799 = vmatprep.subr.bf16.mxu1 %v829_v16 }
  0x3b   :  { %743 = vmatpush3.bf16.msra.mxu0 %v830_v17  ;;  %807 = vmatpush3.bf16.msra.mxu1 %v830_v17 }
  0x3e   :  { %340 = vmatmul.mubr.bf16.vlgmr.msra.gmra.mxu0 %v831_v18  ;;  %372 = vmatmul.mubr.bf16.vlgmr.msra.gmra.mxu1 %v834_v19 }
  0x3f   :  { %347 = vmatprep.mubr.bf16.mxu0 %v837_v20  ;;  %379 = vmatprep.mubr.bf16.mxu1 %v839_v21 }
  0x46   :  { %348 = vmatmul.mubr.bf16.gmra.mxu0 %v841_v22  ;;  %380 = vmatmul.mubr.bf16.gmra.mxu1 %v842_v23 }
  0x47   :  { %355 = vmatprep.mubr.bf16.mxu0 %v843_v24  ;;  %387 = vmatprep.mubr.bf16.mxu1 %v845_v25 }
  0x4e   :  { %356 = vmatmul.mubr.bf16.gmra.mxu0 %v847_v26  ;;  %388 = vmatmul.mubr.bf16.gmra.mxu1 %v848_v27 }
  0x4f   :  { %363 = vmatprep.mubr.bf16.mxu0 %v849_v28  ;;  %395 = vmatprep.mubr.bf16.mxu1 %v851_v29 }
  0x56   :  { %364 = vmatmul.mubr.bf16.gmra.mxu0 %v853_v30  ;;  %396 = vmatmul.mubr.bf16.gmra.mxu1 %v854_v31 }
  0xfe   :  { %v744_v32 = vpop.f32.mrf.mxu0  ;;  %v768_v33 = vpop.f32.mrf.mxu1 }
 0x100   :  { %v745_v34 = vpop.f32.mrf.mxu0  ;;  %v769_v36 = vpop.f32.mrf.mxu1 }
 0x101   :  { %v746_v37 = vadd.f32 %v745_v34, %v744_v32  ;;  %v770_v38 = vadd.f32 %v769_v36, %v768_v33 }
 0x102   :  { %v747_v39 = vpop.f32.mrf.mxu0  ;;  %v771_v40 = vpop.f32.mrf.mxu1 }
 0x103   :  { %v462_v41 = vmul.f32 %v746_v37, %v965_v35  ;;  %v470_v42 = vmul.f32 %v770_v38, %v965_v35 }
 0x104   :  { %v748_v44 = vpop.f32.mrf.mxu0  ;;  %v772_v45 = vpop.f32.mrf.mxu1 }
 0x105   :  { %v749_v46 = vadd.f32 %v748_v44, %v747_v39  ;;  %v773_v47 = vadd.f32 %v772_v45, %v771_v40  ;;  %v485_v50 = vadd.f32 %v972_v43, %v462_v41  ;;  %v493_v51 = vadd.f32 %v972_v43, %v470_v42 }
 0x106   :  { %v750_v48 = vpop.f32.mrf.mxu0  ;;  %v774_v49 = vpop.f32.mrf.mxu1 }
 0x107   :  { %v463_v52 = vmul.f32 %v749_v46, %v965_v35  ;;  %v471_v53 = vmul.f32 %v773_v47, %v965_v35  ;;  %v501_v62 = vmax.f32 %v485_v50, 0.0  ;;  %v509_v63 = vmax.f32 %v493_v51, 0.0 }
 0x108   :  { %v751_v54 = vpop.f32.mrf.mxu0  ;;  %v775_v55 = vpop.f32.mrf.mxu1 }
 0x109   :  { %v486_v56 = vadd.f32 %v972_v43, %v463_v52  ;;  %v494_v57 = vadd.f32 %v972_v43, %v471_v53  ;;  %v752_v58 = vadd.f32 %v751_v54, %v750_v48  ;;  %v776_v59 = vadd.f32 %v775_v55, %v774_v49 }
 0x10a   :  { %v753_v60 = vpop.f32.mrf.mxu0  ;;  %v777_v61 = vpop.f32.mrf.mxu1 }
 0x10b   :  { %v502_v0 = vmax.f32 %v486_v56, 0.0  ;;  %v510_v1 = vmax.f32 %v494_v57, 0.0  ;;  %v464_v2 = vmul.f32 %v752_v58, %v965_v35  ;;  %v472_v3 = vmul.f32 %v776_v59, %v965_v35 }
 0x10c   :  { %v754_v4 = vpop.f32.mrf.mxu0  ;;  %v778_v5 = vpop.f32.mrf.mxu1 }
 0x10d   :  { %v684_v6 = vpack.c.bf16 %v502_v0, %v501_v62  ;;  %v704_v7 = vpack.c.bf16 %v510_v1, %v509_v63  ;;  %v755_v8 = vadd.f32 %v754_v4, %v753_v60  ;;  %v779_v9 = vadd.f32 %v778_v5, %v777_v61 }
 0x10e   :  { %v756_v10 = vpop.f32.mrf.mxu0  ;;  %v780_v11 = vpop.f32.mrf.mxu1  ;;  %v487_v12 = vadd.f32 %v972_v43, %v464_v2  ;;  %v495_v13 = vadd.f32 %v972_v43, %v472_v3 }
 0x10f   :  { %685 = vst [vmem:[#allocation8] sm:$0xff] %v684_v6   ;;  %724 = vst [vmem:[#allocation8 + $0x20] sm:$0xff] %v704_v7   ;;  %v465_v14 = vmul.f32 %v755_v8, %v965_v35  ;;  %v473_v15 = vmul.f32 %v779_v9, %v965_v35 }
 0x110   :  { %v757_v16 = vpop.f32.mrf.mxu0  ;;  %v781_v17 = vpop.f32.mrf.mxu1  ;;  %v503_v26 = vmax.f32 %v487_v12, 0.0  ;;  %v511_v27 = vmax.f32 %v495_v13, 0.0 }
 0x111   :  { %v758_v18 = vadd.f32 %v757_v16, %v756_v10  ;;  %v782_v19 = vadd.f32 %v781_v17, %v780_v11  ;;  %v488_v20 = vadd.f32 %v972_v43, %v465_v14  ;;  %v496_v21 = vadd.f32 %v972_v43, %v473_v15 }
 0x112   :  { %v759_v22 = vpop.f32.mrf.mxu0  ;;  %v783_v23 = vpop.f32.mrf.mxu1 }
 0x113   :  { %v466_v24 = vmul.f32 %v758_v18, %v965_v35  ;;  %v474_v25 = vmul.f32 %v782_v19, %v965_v35  ;;  %v504_v28 = vmax.f32 %v488_v20, 0.0  ;;  %v512_v29 = vmax.f32 %v496_v21, 0.0 }
 0x114   :  { %v760_v30 = vpop.f32.mrf.mxu0  ;;  %v784_v31 = vpop.f32.mrf.mxu1 }
 0x115   :  { %v761_v32 = vadd.f32 %v760_v30, %v759_v22  ;;  %v785_v33 = vadd.f32 %v784_v31, %v783_v23  ;;  %v689_v34 = vpack.c.bf16 %v504_v28, %v503_v26  ;;  %v709_v36 = vpack.c.bf16 %v512_v29, %v511_v27 }
 0x116   :  { %v762_v37 = vpop.f32.mrf.mxu0  ;;  %v786_v38 = vpop.f32.mrf.mxu1  ;;  %v489_v39 = vadd.f32 %v972_v43, %v466_v24  ;;  %v497_v40 = vadd.f32 %v972_v43, %v474_v25 }
 0x117   :  { %v467_v41 = vmul.f32 %v761_v32, %v965_v35  ;;  %v475_v42 = vmul.f32 %v785_v33, %v965_v35  ;;  %721 = vst [vmem:[#allocation8 + $0x8] sm:$0xff] %v689_v34   ;;  %725 = vst [vmem:[#allocation8 + $0x28] sm:$0xff] %v709_v36  }
 0x118   :  { %v763_v44 = vpop.f32.mrf.mxu0  ;;  %v787_v45 = vpop.f32.mrf.mxu1  ;;  %v505_v52 = vmax.f32 %v489_v39, 0.0  ;;  %v513_v53 = vmax.f32 %v497_v40, 0.0 }
 0x119   :  { %v490_v46 = vadd.f32 %v972_v43, %v467_v41  ;;  %v498_v47 = vadd.f32 %v972_v43, %v475_v42  ;;  %v764_v48 = vadd.f32 %v763_v44, %v762_v37  ;;  %v788_v49 = vadd.f32 %v787_v45, %v786_v38 }
 0x11a   :  { %v765_v50 = vpop.f32.mrf.mxu0  ;;  %v789_v51 = vpop.f32.mrf.mxu1 }
 0x11b   :  { %v506_v54 = vmax.f32 %v490_v46, 0.0  ;;  %v514_v55 = vmax.f32 %v498_v47, 0.0  ;;  %v468_v56 = vmul.f32 %v764_v48, %v965_v35  ;;  %v476_v57 = vmul.f32 %v788_v49, %v965_v35 }
 0x11c   :  { %v766_v58 = vpop.f32.mrf.mxu0  ;;  %v790_v59 = vpop.f32.mrf.mxu1 }
 0x11d   :  { %v694_v60 = vpack.c.bf16 %v506_v54, %v505_v52  ;;  %v714_v61 = vpack.c.bf16 %v514_v55, %v513_v53  ;;  %v767_v62 = vadd.f32 %v766_v58, %v765_v50  ;;  %v791_v63 = vadd.f32 %v790_v59, %v789_v51 }
 0x11e   :  { %v491_v0 = vadd.f32 %v972_v43, %v468_v56  ;;  %v499_v1 = vadd.f32 %v972_v43, %v476_v57 }
 0x11f   :  { %722 = vst [vmem:[#allocation8 + $0x10] sm:$0xff] %v694_v60   ;;  %726 = vst [vmem:[#allocation8 + $0x30] sm:$0xff] %v714_v61   ;;  %v469_v2 = vmul.f32 %v767_v62, %v965_v35  ;;  %v477_v3 = vmul.f32 %v791_v63, %v965_v35 }
 0x120   :  { %v507_v6 = vmax.f32 %v491_v0, 0.0  ;;  %v515_v7 = vmax.f32 %v499_v1, 0.0 }
 0x121   :  { %v492_v4 = vadd.f32 %v972_v43, %v469_v2  ;;  %v500_v5 = vadd.f32 %v972_v43, %v477_v3 }
 0x123   :  { %v508_v8 = vmax.f32 %v492_v4, 0.0  ;;  %v516_v9 = vmax.f32 %v500_v5, 0.0 }
 0x125   :  { %v699_v10 = vpack.c.bf16 %v508_v8, %v507_v6  ;;  %v719_v11 = vpack.c.bf16 %v516_v9, %v515_v7 }
 0x127   :  { %723 = vst [vmem:[#allocation8 + $0x18] sm:$0xff] %v699_v10   ;;  %727 = vst [vmem:[#allocation8 + $0x38] sm:$0xff] %v719_v11  }
 0x128   :  { %906 = shalt.err (!%p903_p0)
}
 0x129   :  { %608 = dma.vmem_to_hbm [thread:$0]  %s603_s3, 1024, %s1014_s4, [#allocation5], %s925_s25, %s925_s25, %s926_s26  }
 0x12a   :  { %919 = dma.done.wait [#allocation5], 1024  }
 0x12b   :  { %920 = vsyncadd [#allocation5], 4294966272 }
 0x12c   :  { %612 = vsyncpa [#allocation4], 1 }
 0x12d   :  { %613 = vsyncpa [#allocation7], 1 }
 0x12e   :  { %614 = vsyncpa [#allocation5], 1 }

</bundles_post_ra>
